<compile_context>
chip_gen: v7x
topology: tpu7x:2x2x1
jax: 0.10.0
libtpu: 0.0.40
codegen_flags: <defaults>
</compile_context>

<pallas_src>
import jax
import jax.numpy as jnp
from jax.experimental import pallas as pl
from jax.experimental.pallas import tpu as pltpu


def _round_up(x, m):
    return (x + m - 1) // m * m


# ------------------------------- kernel --------------------------------------
def ensemble_kernel(wagg_ref, bagg_ref, x_ref, w_ref, b_ref, o_ref):
    """One row tile of the full ensemble; layers statically unrolled.

    wagg_ref : SMEM (L,)        aggregation weights (Linear(L, 1).weight)
    bagg_ref : SMEM (1,)        aggregation bias
    x_ref    : VMEM (tm, L, E)  row tile of x in its ORIGINAL layout
    w_ref    : VMEM (L, E, Cp)  all per-layer classifier weights (resident)
    b_ref    : VMEM (L, 1, Cp)  all per-layer classifier biases  (resident)
    o_ref    : VMEM (tm, Cp)    output tile (f32, lane-dense)
    """
    num_layers = w_ref.shape[0]
    tm, cp = o_ref.shape

    acc = jnp.zeros((tm, cp), jnp.float32)
    for l in range(num_layers):                               # static unroll
        xl = x_ref[:, l, :].astype(w_ref.dtype)               # (tm, E) bf16 for MXU
        h = jnp.dot(xl, w_ref[l], preferred_element_type=jnp.float32)   # (tm, Cp)
        h = jnp.maximum(h + b_ref[l], 0.0)                    # per-layer bias + ReLU
        acc = acc + wagg_ref[l] * h                           # weighted sum over layers
    o_ref[...] = acc + bagg_ref[0]                            # aggregation bias


# ------------------------------- tiling ---------------------------------------
def _choose_tm(N, L, E, Cp, x_itemsize, w_itemsize, tm_max, budget_bytes):
    """Largest row tile (multiple of 8) whose working set fits the VMEM budget."""
    # VMEM layouts pad the last two dims; account for that.
    lp = _round_up(L, 8)                           # x middle dim (x is f32)
    ep_lane = _round_up(E, 128)                    # x last dim
    ep_sub = _round_up(E, 16 if w_itemsize == 2 else 8)   # weight sublane dim

    fixed = 2 * (L * ep_sub * Cp * w_itemsize + L * Cp * 4)   # resident W + b
    per_row = 2 * (lp * ep_lane * x_itemsize + Cp * 4)        # x tile + out tile (x2 buf)

    avail = max(budget_bytes - fixed, 0)
    tm = (avail // max(per_row, 1)) // 8 * 8
    tm = int(max(8, min(tm, tm_max, _round_up(N, 8))))
    # Keep at least 2 row tiles so both v7x TensorCores get work.
    if N > 8 and tm >= N:
        tm = max(8, _round_up((N + 1) // 2, 8))
    return tm


# ------------------------------- wrapper --------------------------------------
def prepare_params(params, compute_dtype=jnp.bfloat16):
    """One-time prep: pad C -> Cp (lane-dense) and cast matmul weights."""
    w, b = params["w"], params["b"]
    L, E, C = w.shape
    Cp = _round_up(C, 128)
    return {
        "w_p": jnp.pad(w, ((0, 0), (0, 0), (0, Cp - C))).astype(compute_dtype),
        "b_p": jnp.pad(b, ((0, 0), (0, Cp - C)))[:, None, :].astype(jnp.float32),
        "w_agg": params["w_agg"].astype(jnp.float32),
        "b_agg": params["b_agg"].astype(jnp.float32),
        "C": C,
    }


def all_layers_ensemble_forward(x, prepared, *, tm_max=512,
                                vmem_limit_bytes=48 * 1024 * 1024):
    """x: (N, L, E).  Returns (result (N, C), None) like the PyTorch module."""
    N, L, E = x.shape
    w_p, b_p = prepared["w_p"], prepared["b_p"]
    C = prepared["C"]
    Cp = w_p.shape[-1]

    tm = _choose_tm(N, L, E, Cp,
                    jnp.dtype(x.dtype).itemsize, jnp.dtype(w_p.dtype).itemsize,
                    tm_max, int(vmem_limit_bytes * 0.8))
    grid = (pl.cdiv(N, tm),)

    out = pl.pallas_call(
        ensemble_kernel,
        out_shape=jax.ShapeDtypeStruct((N, Cp), jnp.float32),
        grid=grid,
        in_specs=[
            pl.BlockSpec(memory_space=pltpu.MemorySpace.SMEM),      # w_agg
            pl.BlockSpec(memory_space=pltpu.MemorySpace.SMEM),      # b_agg
            pl.BlockSpec((tm, L, E), lambda i: (i, 0, 0)),          # x row tile
            pl.BlockSpec((L, E, Cp), lambda i: (0, 0, 0)),          # W (resident)
            pl.BlockSpec((L, 1, Cp), lambda i: (0, 0, 0)),          # b (resident)
        ],
        out_specs=pl.BlockSpec((tm, Cp), lambda i: (i, 0)),
        compiler_params=pltpu.CompilerParams(
            dimension_semantics=("parallel",),
            vmem_limit_bytes=vmem_limit_bytes,
        ),
    )(prepared["w_agg"], prepared["b_agg"], x, w_p, b_p)

    return out[:, :C], None


# ------------------------------- params / reference ---------------------------
def init_params(key, num_llm_layers, embedding_size, output_size):
    kw, kb, ka, kba = jax.random.split(key, 4)
    L, E, C = num_llm_layers, embedding_size, output_size
    return {
        "w": 0.02 * jax.random.normal(kw, (L, E, C), jnp.float32),   # Linear.weight.T
        "b": 0.02 * jax.random.normal(kb, (L, C), jnp.float32),
        "w_agg": 0.1 * jax.random.normal(ka, (L,), jnp.float32),
        "b_agg": 0.1 * jax.random.normal(kba, (1,), jnp.float32),
    }


def reference_forward(x, params):
    # Pure-JAX mirror of the PyTorch module (f32, for correctness checking).
    outs = jnp.einsum("nle,lec->lnc", x, params["w"]) + params["b"][:, None, :]
    outs = jnp.transpose(outs, (1, 2, 0))                       # (N, C, L)
    act = jnp.maximum(outs, 0.0)
    return jnp.einsum("ncl,l->nc", act, params["w_agg"]) + params["b_agg"][0]


# ------------------------------- main ------------------------------------------
if __name__ == "__main__":
    # N tokens, L llm layers, E embedding size, C output classes
    N, L, E, C = 16, 4, 32, 8
    key = jax.random.PRNGKey(0)
    kx, kp = jax.random.split(key)

    x = jax.random.normal(kx, (N, L, E), jnp.float32)
    params = init_params(kp, L, E, C)
    prepared = prepare_params(params)          # one-time pad/cast (not per call)

    result, aux = all_layers_ensemble_forward(x, prepared)
    jax.block_until_ready(result)
    assert result.shape == (N, C) and aux is None

    ref = reference_forward(x, params)
    err = float(jnp.max(jnp.abs(result - ref)))
    assert jnp.allclose(result, ref, atol=1e-2, rtol=1e-2), err
    print("KERNEL_OK")
</pallas_src>

<mosaic_0001>
module attributes {stable_mosaic.version = 11 : i64} {
  func.func @ensemble_kernel(%arg0: i32, %arg1: memref<4xf32, #tpu.memory_space<smem>>, %arg2: memref<1xf32, #tpu.memory_space<smem>>, %arg3: memref<8x4x32xf32, #tpu.memory_space<vmem>>, %arg4: memref<4x32x128xbf16, #tpu.memory_space<vmem>>, %arg5: memref<4x1x128xf32, #tpu.memory_space<vmem>>, %arg6: memref<8x128xf32, #tpu.memory_space<vmem>>) attributes {dimension_semantics = [#tpu.dimension_semantics<parallel>], iteration_bounds = array<i64: 2>, scalar_prefetch = 0 : i64, scratch_operands = 0 : i64, tpu.core_type = #tpu.core_type<tc>, window_params = [{transform_indices = @transform_0, window_bounds = array<i64: 4>}, {transform_indices = @transform_1, window_bounds = array<i64: 1>}, {transform_indices = @transform_2, window_bounds = array<i64: 8, 4, 32>}, {pipeline_mode = #tpu.pipeline_mode<synchronous>, transform_indices = @transform_3, window_bounds = array<i64: 4, 32, 128>}, {pipeline_mode = #tpu.pipeline_mode<synchronous>, transform_indices = @transform_4, window_bounds = array<i64: 4, 1, 128>}, {transform_indices = @transform_5, window_bounds = array<i64: 8, 128>}]} {
    %cst = arith.constant 0.000000e+00 : f32
    %0 = vector.broadcast %cst : f32 to vector<8x128xf32>
    %c0 = arith.constant 0 : index
    %c0_0 = arith.constant 0 : index
    %c0_1 = arith.constant 0 : index
    %1 = vector.load %arg3[%c0, %c0_0, %c0_1] : memref<8x4x32xf32, #tpu.memory_space<vmem>>, vector<8x1x32xf32>
    %2 = vector.shape_cast %1 : vector<8x1x32xf32> to vector<8x32xf32>
    %3 = arith.truncf %2 : vector<8x32xf32> to vector<8x32xbf16>
    %c0_2 = arith.constant 0 : index
    %c0_3 = arith.constant 0 : index
    %c0_4 = arith.constant 0 : index
    %4 = vector.load %arg4[%c0_2, %c0_3, %c0_4] : memref<4x32x128xbf16, #tpu.memory_space<vmem>>, vector<1x32x128xbf16>
    %5 = vector.shape_cast %4 : vector<1x32x128xbf16> to vector<32x128xbf16>
    %cst_5 = arith.constant dense<0.000000e+00> : vector<8x128xf32>
    %6 = tpu.matmul %3, %5, %cst_5 {dimension_numbers = #tpu.dot_dimension_numbers<[1], [0], [0], [1], [0, 0, 1, 1], [], []>} : vector<8x32xbf16>, vector<32x128xbf16>, vector<8x128xf32> -> vector<8x128xf32>
    %c0_6 = arith.constant 0 : index
    %c0_7 = arith.constant 0 : index
    %c0_8 = arith.constant 0 : index
    %7 = vector.load %arg5[%c0_6, %c0_7, %c0_8] : memref<4x1x128xf32, #tpu.memory_space<vmem>>, vector<1x1x128xf32>
    %8 = vector.shape_cast %7 : vector<1x1x128xf32> to vector<1x128xf32>
    %9 = vector.broadcast %8 : vector<1x128xf32> to vector<8x128xf32>
    %10 = arith.addf %6, %9 : vector<8x128xf32>
    %cst_9 = arith.constant 0.000000e+00 : f32
    %11 = vector.broadcast %cst_9 : f32 to vector<8x128xf32>
    %12 = arith.maximumf %10, %11 : vector<8x128xf32>
    %c0_10 = arith.constant 0 : index
    %13 = memref.load %arg1[%c0_10] : memref<4xf32, #tpu.memory_space<smem>>
    %14 = vector.broadcast %13 : f32 to vector<8x128xf32>
    %15 = arith.mulf %14, %12 : vector<8x128xf32>
    %16 = arith.addf %0, %15 : vector<8x128xf32>
    %c0_11 = arith.constant 0 : index
    %c1 = arith.constant 1 : index
    %c0_12 = arith.constant 0 : index
    %17 = vector.load %arg3[%c0_11, %c1, %c0_12] : memref<8x4x32xf32, #tpu.memory_space<vmem>>, vector<8x1x32xf32>
    %18 = vector.shape_cast %17 : vector<8x1x32xf32> to vector<8x32xf32>
    %19 = arith.truncf %18 : vector<8x32xf32> to vector<8x32xbf16>
    %c1_13 = arith.constant 1 : index
    %c0_14 = arith.constant 0 : index
    %c0_15 = arith.constant 0 : index
    %20 = vector.load %arg4[%c1_13, %c0_14, %c0_15] : memref<4x32x128xbf16, #tpu.memory_space<vmem>>, vector<1x32x128xbf16>
    %21 = vector.shape_cast %20 : vector<1x32x128xbf16> to vector<32x128xbf16>
    %cst_16 = arith.constant dense<0.000000e+00> : vector<8x128xf32>
    %22 = tpu.matmul %19, %21, %cst_16 {dimension_numbers = #tpu.dot_dimension_numbers<[1], [0], [0], [1], [0, 0, 1, 1], [], []>} : vector<8x32xbf16>, vector<32x128xbf16>, vector<8x128xf32> -> vector<8x128xf32>
    %c1_17 = arith.constant 1 : index
    %c0_18 = arith.constant 0 : index
    %c0_19 = arith.constant 0 : index
    %23 = vector.load %arg5[%c1_17, %c0_18, %c0_19] : memref<4x1x128xf32, #tpu.memory_space<vmem>>, vector<1x1x128xf32>
    %24 = vector.shape_cast %23 : vector<1x1x128xf32> to vector<1x128xf32>
    %25 = vector.broadcast %24 : vector<1x128xf32> to vector<8x128xf32>
    %26 = arith.addf %22, %25 : vector<8x128xf32>
    %cst_20 = arith.constant 0.000000e+00 : f32
    %27 = vector.broadcast %cst_20 : f32 to vector<8x128xf32>
    %28 = arith.maximumf %26, %27 : vector<8x128xf32>
    %c1_21 = arith.constant 1 : index
    %29 = memref.load %arg1[%c1_21] : memref<4xf32, #tpu.memory_space<smem>>
    %30 = vector.broadcast %29 : f32 to vector<8x128xf32>
    %31 = arith.mulf %30, %28 : vector<8x128xf32>
    %32 = arith.addf %16, %31 : vector<8x128xf32>
    %c0_22 = arith.constant 0 : index
    %c2 = arith.constant 2 : index
    %c0_23 = arith.constant 0 : index
    %33 = vector.load %arg3[%c0_22, %c2, %c0_23] : memref<8x4x32xf32, #tpu.memory_space<vmem>>, vector<8x1x32xf32>
    %34 = vector.shape_cast %33 : vector<8x1x32xf32> to vector<8x32xf32>
    %35 = arith.truncf %34 : vector<8x32xf32> to vector<8x32xbf16>
    %c2_24 = arith.constant 2 : index
    %c0_25 = arith.constant 0 : index
    %c0_26 = arith.constant 0 : index
    %36 = vector.load %arg4[%c2_24, %c0_25, %c0_26] : memref<4x32x128xbf16, #tpu.memory_space<vmem>>, vector<1x32x128xbf16>
    %37 = vector.shape_cast %36 : vector<1x32x128xbf16> to vector<32x128xbf16>
    %cst_27 = arith.constant dense<0.000000e+00> : vector<8x128xf32>
    %38 = tpu.matmul %35, %37, %cst_27 {dimension_numbers = #tpu.dot_dimension_numbers<[1], [0], [0], [1], [0, 0, 1, 1], [], []>} : vector<8x32xbf16>, vector<32x128xbf16>, vector<8x128xf32> -> vector<8x128xf32>
    %c2_28 = arith.constant 2 : index
    %c0_29 = arith.constant 0 : index
    %c0_30 = arith.constant 0 : index
    %39 = vector.load %arg5[%c2_28, %c0_29, %c0_30] : memref<4x1x128xf32, #tpu.memory_space<vmem>>, vector<1x1x128xf32>
    %40 = vector.shape_cast %39 : vector<1x1x128xf32> to vector<1x128xf32>
    %41 = vector.broadcast %40 : vector<1x128xf32> to vector<8x128xf32>
    %42 = arith.addf %38, %41 : vector<8x128xf32>
    %cst_31 = arith.constant 0.000000e+00 : f32
    %43 = vector.broadcast %cst_31 : f32 to vector<8x128xf32>
    %44 = arith.maximumf %42, %43 : vector<8x128xf32>
    %c2_32 = arith.constant 2 : index
    %45 = memref.load %arg1[%c2_32] : memref<4xf32, #tpu.memory_space<smem>>
    %46 = vector.broadcast %45 : f32 to vector<8x128xf32>
    %47 = arith.mulf %46, %44 : vector<8x128xf32>
    %48 = arith.addf %32, %47 : vector<8x128xf32>
    %c0_33 = arith.constant 0 : index
    %c3 = arith.constant 3 : index
    %c0_34 = arith.constant 0 : index
    %49 = vector.load %arg3[%c0_33, %c3, %c0_34] : memref<8x4x32xf32, #tpu.memory_space<vmem>>, vector<8x1x32xf32>
    %50 = vector.shape_cast %49 : vector<8x1x32xf32> to vector<8x32xf32>
    %51 = arith.truncf %50 : vector<8x32xf32> to vector<8x32xbf16>
    %c3_35 = arith.constant 3 : index
    %c0_36 = arith.constant 0 : index
    %c0_37 = arith.constant 0 : index
    %52 = vector.load %arg4[%c3_35, %c0_36, %c0_37] : memref<4x32x128xbf16, #tpu.memory_space<vmem>>, vector<1x32x128xbf16>
    %53 = vector.shape_cast %52 : vector<1x32x128xbf16> to vector<32x128xbf16>
    %cst_38 = arith.constant dense<0.000000e+00> : vector<8x128xf32>
    %54 = tpu.matmul %51, %53, %cst_38 {dimension_numbers = #tpu.dot_dimension_numbers<[1], [0], [0], [1], [0, 0, 1, 1], [], []>} : vector<8x32xbf16>, vector<32x128xbf16>, vector<8x128xf32> -> vector<8x128xf32>
    %c3_39 = arith.constant 3 : index
    %c0_40 = arith.constant 0 : index
    %c0_41 = arith.constant 0 : index
    %55 = vector.load %arg5[%c3_39, %c0_40, %c0_41] : memref<4x1x128xf32, #tpu.memory_space<vmem>>, vector<1x1x128xf32>
    %56 = vector.shape_cast %55 : vector<1x1x128xf32> to vector<1x128xf32>
    %57 = vector.broadcast %56 : vector<1x128xf32> to vector<8x128xf32>
    %58 = arith.addf %54, %57 : vector<8x128xf32>
    %cst_42 = arith.constant 0.000000e+00 : f32
    %59 = vector.broadcast %cst_42 : f32 to vector<8x128xf32>
    %60 = arith.maximumf %58, %59 : vector<8x128xf32>
    %c3_43 = arith.constant 3 : index
    %61 = memref.load %arg1[%c3_43] : memref<4xf32, #tpu.memory_space<smem>>
    %62 = vector.broadcast %61 : f32 to vector<8x128xf32>
    %63 = arith.mulf %62, %60 : vector<8x128xf32>
    %64 = arith.addf %48, %63 : vector<8x128xf32>
    %c0_44 = arith.constant 0 : index
    %65 = memref.load %arg2[%c0_44] : memref<1xf32, #tpu.memory_space<smem>>
    %66 = vector.broadcast %65 : f32 to vector<8x128xf32>
    %67 = arith.addf %64, %66 : vector<8x128xf32>
    %c0_45 = arith.constant 0 : index
    %c0_46 = arith.constant 0 : index
    %68 = vector.load %arg6[%c0_45, %c0_46] : memref<8x128xf32, #tpu.memory_space<vmem>>, vector<8x128xf32>
    tpu.vector_store %arg6[%c0_45, %c0_46], %67 {strides = array<i32>} : memref<8x128xf32, #tpu.memory_space<vmem>>, vector<8x128xf32>,
    return
  }
  func.func @transform_0(%arg0: i32) -> i32 {
    %c0_i32 = arith.constant 0 : i32
    %c0_i32_0 = arith.constant 0 : i32
    return %c0_i32 : i32
  }
  func.func @transform_1(%arg0: i32) -> i32 {
    %c0_i32 = arith.constant 0 : i32
    %c0_i32_0 = arith.constant 0 : i32
    return %c0_i32 : i32
  }
  func.func @transform_2(%arg0: i32) -> (i32, i32, i32) {
    %c0_i32 = arith.constant 0 : i32
    %c0_i32_0 = arith.constant 0 : i32
    %c0_i32_1 = arith.constant 0 : i32
    return %arg0, %c0_i32, %c0_i32_0 : i32, i32, i32
  }
  func.func @transform_3(%arg0: i32) -> (i32, i32, i32) {
    %c0_i32 = arith.constant 0 : i32
    %c0_i32_0 = arith.constant 0 : i32
    %c0_i32_1 = arith.constant 0 : i32
    %c0_i32_2 = arith.constant 0 : i32
    return %c0_i32, %c0_i32_0, %c0_i32_1 : i32, i32, i32
  }
  func.func @transform_4(%arg0: i32) -> (i32, i32, i32) {
    %c0_i32 = arith.constant 0 : i32
    %c0_i32_0 = arith.constant 0 : i32
    %c0_i32_1 = arith.constant 0 : i32
    %c0_i32_2 = arith.constant 0 : i32
    return %c0_i32, %c0_i32_0, %c0_i32_1 : i32, i32, i32
  }
  func.func @transform_5(%arg0: i32) -> (i32, i32) {
    %c0_i32 = arith.constant 0 : i32
    %c0_i32_0 = arith.constant 0 : i32
    return %arg0, %c0_i32 : i32, i32
  }
}

</mosaic_0001>

<bundles_post_ra>
// kernel: tpu_custom_call.1
= control target key start
LH: loop header
LB: loop body
LE: loop exit
PB: predicated region body
PF: predicated region fallthrough
CT: control target
= control target key end

     0   :  { %s1546_s0 = inlined_call_operand.vmem [shape: f32[4], index: 0, kind: input, shape index: {}]   ;;  %s1547_s1 = inlined_call_operand.<no memory space> [shape: f32[1], index: 1, kind: input, shape index: {}]   ;;  %s1548_s2 = inlined_call_operand.hbm [shape: f32[16,4,32], index: 2, kind: input, shape index: {}]   ;;  %s1549_s3 = inlined_call_operand.hbm [shape: bf16[4,32,128], index: 3, kind: input, shape index: {}]   ;;  %s1550_s4 = inlined_call_operand.vmem [shape: f32[4,1,128], index: 4, kind: input, shape index: {}]   ;;  %s1551_s5 = inlined_call_operand.hbm [shape: f32[16,128], index: 5, kind: output, shape index: {}]  }
   0x1   :  { %1555 = sst [smem:[#allocation15_spill]] %s1546_s0 }
   0x2   :  { %10 = sst [smem:[#allocation2]] %s1547_s1 }
   0x3   :  { %11 = vsyncpa [#allocation6], 0 }
   0x4   :  { %12 = vsyncpa [#allocation4], 0 }
   0x5   :  { %14 = vsyncpa [#allocation4 + $0x1], 0 }
   0x6   :  { %15 = vsyncpa [#allocation9], 0 }
   0x7   :  { %16 = vsyncpa [#allocation5], 0 }
   0x8   :  { %18 = vsyncpa [#allocation5 + $0x1], 0  ;;  %s1224_s20 = smov 0   ;;  %s1226_s21 = smov 0  }
   0x9   :  { %s1228_s22 = smov 0   ;;  %s1230_s23 = smov 0  }
   0xa LB: > { %s1245_s1 = sadd.s32 4294967295, %s1181_s23   ;;  %s871_s24 = sadd.s32 4294967294, %s1181_s23   ;;  %s1181_s23 = sphi %s1230_s23, %s1575_s23   ;;  %s1177_s22 = sphi %s1228_s22, %s1574_s22   ;;  %s1173_s21 = sphi %s1226_s21, %s1573_s21   ;;  %s1169_s20 = sphi %s1224_s20, %s1572_s20  }
   0xb   : > { %s1249_s25 = sadd.s32 1, %s1181_s23   ;;  %s73_s26 = sadd.s32 1, %s1177_s22 }
   0xc   : > { %s70_s27 = ssub.s32 %s1181_s23, %s1249_s25  ;;  %p80_p0 = scmp.ne.s32.totalorder %s1177_s22, %s1173_s21 }
   0xd   : > { %p71_p1 = scmp.eq.s32.totalorder %s70_s27, 0  ;;  %p81_p2 = scmp.eq.s32.totalorder %s1181_s23, 0 }
   0xe   : > { %p86_p3 = scmp.ne.s32.totalorder %s1173_s21, %s1169_s20  ;;  %p1552_p4 = scmp.eq.s32.totalorder %s1245_s1, 0 }
   0xf   : > { %s1261_s28 = scalar_select %p71_p1, %s1177_s22, %s73_s26  }
  0x10   : > { %p1263_p5 = por %p81_p2, %p80_p0  ;;  %p1269_p6 = por %p1552_p4, %p86_p3 }
  0x11   : > { %p152_p7 = scmp.eq.s32.totalorder %s1245_s1, 1  ;;  %p158_p8 = scmp.eq.s32.totalorder %s871_s24, 1 }
  0x12   : > { %s1557_s30 = scalar_select %p1269_p6, 1, 0 }
  0x13   : > { %p872_p9 = scmp.ge.s32.totalorder %s1181_s23, 1  ;;  %p165_p10 = scmp.lt.s32.totalorder %s1181_s23, 3 }
  0x14   : > { %p1276_p11 = por %p152_p7, %p80_p0  ;;  %p1280_p12 = por %p158_p8, %p86_p3 }
  0x15   : > { %p1284_p13 = pnand %p872_p9, %p165_p10  ;;  %s1561_s0 = sld [smem:[#allocation15_spill]] }
  0x16   : > { %s1558_s6 = scalar_select %p1276_p11, 1, 0 }
  0x17   : > { %s1559_s7 = scalar_select %p1280_p12, 1, 0 }
  0x18   : > { %p967_p1 = pneg %p1284_p13  ;;  %p984_p2 = scmp.lt.s32.totalorder %s1181_s23, 2 }
  0x19   : > { %s1183_s14 = smov [#allocation8]  }
  0x1a   : > { %p1297_p7 = pnand %p967_p1, %p1552_p4  ;;  %p1303_p3 = pnand %p984_p2, %p1263_p5 }
  0x1b   : > { %s178_s11 = sshll.u32 %s1561_s0, 4  ;;  %s191_s15 = sshll.u32 %s1183_s14, 4  ;;  %s179_s11 = int_to_ptr.vmem [resolvable:$true] %s178_s11  ;;  %s1307_s15 = int_to_ptr.vmem [resolvable:$true] %s191_s15 }
  0x1c   : > { %s1034_s16 = scalar_lea.vmem %s179_s11, 16  ;;  %p1036_p9 = pneg %p1297_p7 }
  0x1d   : > { %p1035_p8 = scmp.ne.s32.totalorder %s179_s11, %s1034_s16  ;;  %p1042_p0 = scmp.lt.s32.totalorder %s179_s11, %s179_s11 }
  0x1e   : > { %p1043_p4 = scmp.lt.s32.totalorder %s1034_s16, %s1034_s16 }
  0x1f   : > { %p1037_p10 = pnand %p1036_p9, %p1035_p8 }
  0x20   : > { %p1044_p12 = por %p1043_p4, %p1042_p0 }
  0x21   : > { %p1038_p1 = pneg %p1037_p10 }
  0x23   : > { %p1045_p11 = pnand %p1044_p12, %p1038_p1 }
  0x25   : > { %1048 = shalt.err (!%p1045_p11)
}
  0x26   : > { %s1184_s17 = smov [#allocation3]   ;;  %s208_s18 = sand.u32 1, %s1177_s22  }
  0x27   : > { %970 = dma.vmem_to_smem (!%p1297_p7), %s179_s11, 16, %s1184_s17, [#allocation6]  }
  0x28   : > { %s1049_s26 = scalar_lea.hbm %s1549_s3, 1024 }
  0x29   : > { %p1050_p5 = scmp.ne.s32.totalorder %s1549_s3, %s1049_s26  ;;  %p1056_p11 = scmp.lt.u32.totalorder %s1049_s26, %s1549_s3 }
  0x2b   : > { %p1052_p4 = pnand %p1050_p5, %p1036_p9 }
  0x2d   : > { %p1053_p12 = pneg %p1052_p4 }
  0x2f   : > { %p1058_p0 = pnand %p1056_p11, %p1053_p12 }
  0x31   : > { %1061 = shalt.err (!%p1058_p0)
}
  0x32   : > { %s1062_s11 = scalar_lea.vmem %s1307_s15, 1024  ;;  %p1070_p1 = scmp.lt.s32.totalorder %s1307_s15, %s1307_s15 }
  0x33   : > { %p1063_p2 = scmp.ne.s32.totalorder %s1307_s15, %s1062_s11  ;;  %p1071_p5 = scmp.lt.s32.totalorder %s1062_s11, %s1062_s11 }
  0x35   : > { %p1065_p8 = pnand %p1063_p2, %p1036_p9  ;;  %p1072_p4 = por %p1071_p5, %p1070_p1 }
  0x37   : > { %p1066_p10 = pneg %p1065_p8 }
  0x39   : > { %p1073_p6 = pnand %p1072_p4, %p1066_p10 }
  0x3b   : > { %1076 = shalt.err (!%p1073_p6)
}
  0x3c   : > { %s1185_s14 = smov 64   ;;  %s1186_s16 = smov 4  }
  0x3d   : > { %973 = dma.hbm_to_vmem [thread:$0]  (!%p1297_p7), %s1549_s3, 1024, %s1307_s15, [#allocation9], %s1185_s14, %s1185_s14, %s1186_s16  }
  0x3e   : > { %s876_s24 = sshll.u32 %s208_s18, 5  ;;  %s910_s26 = sshll.u32 %s1181_s23, 9 }
  0x3f   : > { %s1349_s9 = scalar_lea.hbm %s1548_s2, %s910_s26  ;;  %s212_s10 = scalar_lea.vmem [#allocation7], %s876_s24 }
  0x40   : > { %s219_s12 = sshll.u32 %s212_s10, 4  ;;  %s1353_s11 = scalar_lea.sflag [#allocation4], %s208_s18  ;;  %s1351_s12 = int_to_ptr.vmem [resolvable:$true] %s219_s12 }
  0x41   : > { %s1077_s0 = scalar_lea.hbm %s1349_s9, 512  ;;  %p1079_p7 = pneg %p1303_p3 }
  0x42   : > { %p1078_p6 = scmp.ne.s32.totalorder %s1349_s9, %s1077_s0  ;;  %s1082_s19 = scalar_lea.hbm %s1548_s2, 1024 }
  0x43   : > { %p1083_p11 = scmp.lt.u32.totalorder %s1349_s9, %s1548_s2  ;;  %p1084_p0 = scmp.lt.u32.totalorder %s1082_s19, %s1077_s0 }
  0x44   : > { %p1080_p9 = pnand %p1079_p7, %p1078_p6  ;;  %p1086_p8 = scmp.lt.u32.totalorder %s1077_s0, %s1349_s9 }
  0x45   : > { %p1085_p2 = por %p1084_p0, %p1083_p11 }
  0x46   : > { %p1081_p12 = pneg %p1080_p9 }
  0x47   : > { %p1087_p10 = por %p1086_p8, %p1085_p2 }
  0x49   : > { %p1088_p1 = pnand %p1087_p10, %p1081_p12 }
  0x4b   : > { %1091 = shalt.err (!%p1088_p1)
}
  0x4c   : > { %s1092_s18 = scalar_lea.vmem %s1351_s12, 512  ;;  %s1187_s24 = smov [#allocation7]  }
  0x4d   : > { %p1093_p5 = scmp.ne.s32.totalorder %s1351_s12, %s1092_s18  ;;  %s1097_s29 = sshll.u32 %s1187_s24, 4  ;;  %s1098_s29 = int_to_ptr.vmem [resolvable:$false] %s1097_s29 }
  0x4e   : > { %s1099_s10 = scalar_lea.vmem %s1098_s29, 1024  ;;  %p1100_p9 = scmp.lt.s32.totalorder %s1351_s12, %s1098_s29 }
  0x4f   : > { %p1095_p4 = pnand %p1093_p5, %p1079_p7  ;;  %p1101_p11 = scmp.lt.s32.totalorder %s1099_s10, %s1092_s18 }
  0x51   : > { %p1096_p6 = pneg %p1095_p4  ;;  %p1102_p0 = por %p1101_p11, %p1100_p9 }
  0x53   : > { %p1103_p2 = pnand %p1102_p0, %p1096_p6 }
  0x55   : > { %1106 = shalt.err (!%p1103_p2)
}
  0x56   : > { %977 = dma.hbm_to_vmem [thread:$0]  (!%p1303_p3), %s1349_s9, 512, %s1351_s12, %s1353_s11, %s1185_s14, %s1185_s14, %s1186_s16  }
  0x57   : > { %231 = sbr.rel (%p1284_p13) target bundleno = 382 (0x17e), region = 40  ;;  %p1564_p7 = scmp.eq.s32.totalorder (!%p1284_p13), %s1245_s1, 0 }
  0x5e   : > { %1152 = dma.done.wait (%p1564_p7), [#allocation6], 16   ;;  %p1565_p12 = pmov %p1564_p7 }
  0x5f   : > { %s1391_s0 = sand.u32 1, %s1173_s21   ;;  %p1566_p3 = scmp.ne.s32.totalorder %s1557_s30, 0 }
  0x60   : > { %1154 = vsyncadd (%p1565_p12), [#allocation6], 4294967280  ;;  %s881_s13 = sshll.u32 %s1391_s0, 5  ;;  %s238_s15 = scalar_lea.sflag [#allocation4], %s1391_s0 }
  0x61   : > { %s1395_s17 = scalar_lea.vmem [#allocation7], %s881_s13 }
  0x62   : > { %1156 = dma.done.wait (%p1566_p3), %s238_s15, 512  }
  0x63   : > { %1158 = vsyncadd (%p1566_p3), %s238_s15, 4294966784  ;;  %p1567_p13 = pmov %p1564_p7 }
  0x64   : > { %p1568_p8 = pmov %p1564_p7 }
  0x65   : > { %1160 = dma.done.wait (%p1567_p13), [#allocation9], 1024  }
  0x66   : > { %1162 = vsyncadd (%p1568_p8), [#allocation9], 4294966272 }
  0x67   : > { %250 = sfence }
  0x68   : > { %v1026_v0 = vld [vmem:[#allocation8] sm:$0xff]   ;;  %v1188_v1 = vmov 0.0   ;;  %v1027_v2 = vld [vmem:[#allocation8 + $0x10] sm:$0xff]   ;;  %v1028_v3 = vld [vmem:[#allocation8 + $0x8] sm:$0xff]   ;;  %vm1189_vm0 = vmmov 0   ;;  %vm319_vm1 = vcmask 1041409  }
  0x69   : > { %923 = vmatprep.subr.bf16.mxu0 %v1188_v1  ;;  %931 = vmatprep.subr.bf16.mxu1 %v1188_v1  ;;  %v1029_v4 = vld [vmem:[#allocation8 + $0x18] sm:$0xff]   ;;  %vm322_vm2 = vcmask 1042434   ;;  %v275_v5 = vld [vmem:[%s1395_s17] sm:$0x1]  ;;  %v276_v6 = vld [vmem:[%s1395_s17 + $0x4] sm:$0x1] }
  0x6a   : > { %924 = vmatpush3.bf16.msra.mxu0 %v1026_v0  ;;  %927 = vmatprep.mubr.msk.bf16.mxu0 %vm1189_vm0, %v1188_v1  ;;  %v277_v7 = vld [vmem:[%s1395_s17 + $0x8] sm:$0x1]  ;;  %v278_v8 = vld [vmem:[%s1395_s17 + $0xc] sm:$0x1]  ;;  %v279_v9 = vld [vmem:[%s1395_s17 + $0x10] sm:$0x1]  ;;  %v283_v11 = vpack.c.bf16 %v275_v5, %v275_v5  ;;  %v284_v12 = vpack.c.bf16 %v276_v6, %v276_v6 }
  0x6b   : > { %932 = vmatpush3.bf16.msra.mxu1 %v1027_v2  ;;  %925 = vmatprep.subr.bf16.mxu0 %v1188_v1  ;;  %v280_v10 = vld [vmem:[%s1395_s17 + $0x14] sm:$0x1]  ;;  %v285_v13 = vpack.c.bf16 %v277_v7, %v277_v7  ;;  %v281_v14 = vld [vmem:[%s1395_s17 + $0x18] sm:$0x1]  ;;  %v282_v15 = vld [vmem:[%s1395_s17 + $0x1c] sm:$0x1]  ;;  %v286_v16 = vpack.c.bf16 %v278_v8, %v278_v8  ;;  %v287_v17 = vpack.c.bf16 %v279_v9, %v279_v9 }
  0x6c   : > { %933 = vmatprep.subr.bf16.mxu1 %v1188_v1  ;;  %935 = vmatprep.mubr.msk.bf16.mxu1 %vm1189_vm0, %v1188_v1  ;;  %v288_v18 = vpack.c.bf16 %v280_v10, %v280_v10  ;;  %vm325_vm3 = vcmask 1043459   ;;  %v289_v19 = vpack.c.bf16 %v281_v14, %v281_v14  ;;  %v290_v20 = vpack.c.bf16 %v282_v15, %v282_v15  ;;  %v401_v27 = vld [vmem:[%s1395_s17 + $0x1] sm:$0x1]  ;;  %v402_v28 = vld [vmem:[%s1395_s17 + $0x5] sm:$0x1]  ;;  %s397_s14 = sld [smem:[#allocation3]] }
  0x6d   : > { %v310_v21 = vunpack.c.l.b16 %v283_v11  ;;  %v311_v22 = vunpack.c.l.b16 %v284_v12  ;;  %v312_v23 = vunpack.c.l.b16 %v285_v13  ;;  %v313_v24 = vunpack.c.l.b16 %v286_v16  ;;  %v403_v29 = vld [vmem:[%s1395_s17 + $0x9] sm:$0x1]  ;;  %v404_v33 = vld [vmem:[%s1395_s17 + $0xd] sm:$0x1]  ;;  %v405_v34 = vld [vmem:[%s1395_s17 + $0x11] sm:$0x1] }
  0x6e   : > { %926 = vmatpush3.bf16.msra.mxu0 %v1028_v3  ;;  %v314_v25 = vunpack.c.l.b16 %v287_v17  ;;  %v315_v26 = vunpack.c.l.b16 %v288_v18  ;;  %v316_v30 = vunpack.c.l.b16 %v289_v19  ;;  %v317_v31 = vunpack.c.l.b16 %v290_v20  ;;  %v406_v35 = vld [vmem:[%s1395_s17 + $0x15] sm:$0x1]  ;;  %v407_v40 = vld [vmem:[%s1395_s17 + $0x19] sm:$0x1]  ;;  %v408_v41 = vld [vmem:[%s1395_s17 + $0x1d] sm:$0x1] }
  0x6f   : > { %934 = vmatpush3.bf16.msra.mxu1 %v1029_v4  ;;  %939 = vmatprep.subr.bf16.mxu0 %v1188_v1  ;;  %v318_v32 = vrot.slane %v311_v22, 7  ;;  %vm328_vm4 = vcmask 1044484   ;;  %v321_v36 = vrot.slane %v312_v23, 6  ;;  %v324_v37 = vrot.slane %v313_v24, 5  ;;  %v1030_v62 = vld [vmem:[#allocation8 + $0x20] sm:$0xff]   ;;  %s893_s16 = sld [smem:[#allocation3 + $0x1]] }
  0x70   : > { %947 = vmatprep.subr.bf16.mxu1 %v1188_v1  ;;  %v327_v38 = vrot.slane %v314_v25, 4  ;;  %v330_v39 = vrot.slane %v315_v26, 3  ;;  %vm331_vm5 = vcmask 1045509   ;;  %v333_v43 = vrot.slane %v316_v30, 2  ;;  %v521_v63 = vld [vmem:[%s1395_s17 + $0x2] sm:$0x1] }
  0x71   : > { %v320_v42 = vsel %vm319_vm1, %v318_v32, %v310_v21  ;;  %vm334_vm6 = vcmask 1046534   ;;  %v336_v45 = vrot.slane %v317_v31, 1  ;;  %vm337_vm7 = vcmask 1047559   ;;  %v522_v5 = vld [vmem:[%s1395_s17 + $0x6] sm:$0x1]  ;;  %v1032_v25 = vld [vmem:[#allocation8 + $0x28] sm:$0xff]  }
  0x72   : > { %v323_v44 = vsel %vm322_vm2, %v321_v36, %v320_v42  ;;  %vm352_vm8 = vcmask 261120   ;;  %v409_v47 = vpack.c.bf16 %v401_v27, %v401_v27  ;;  %v410_v48 = vpack.c.bf16 %v402_v28, %v402_v28  ;;  %v523_v6 = vld [vmem:[%s1395_s17 + $0xa] sm:$0x1]  ;;  %v524_v7 = vld [vmem:[%s1395_s17 + $0xe] sm:$0x1]  ;;  %s899_s11 = sld [smem:[#allocation3 + $0x2]] }
  0x73   : > { %v326_v46 = vsel %vm325_vm3, %v324_v37, %v323_v44  ;;  %v411_v49 = vpack.c.bf16 %v403_v29, %v403_v29  ;;  %v412_v51 = vpack.c.bf16 %v404_v33, %v404_v33  ;;  %v413_v52 = vpack.c.bf16 %v405_v34, %v405_v34  ;;  %v525_v12 = vld [vmem:[%s1395_s17 + $0x12] sm:$0x1]  ;;  %v526_v13 = vld [vmem:[%s1395_s17 + $0x16] sm:$0x1]  ;;  %v527_v17 = vld [vmem:[%s1395_s17 + $0x1a] sm:$0x1] }
  0x74   : > { %v329_v50 = vsel %vm328_vm4, %v327_v38, %v326_v46  ;;  %v414_v53 = vpack.c.bf16 %v406_v35, %v406_v35  ;;  %v415_v55 = vpack.c.bf16 %v407_v40, %v407_v40  ;;  %v416_v56 = vpack.c.bf16 %v408_v41, %v408_v41  ;;  %v528_v20 = vld [vmem:[%s1395_s17 + $0x1e] sm:$0x1]  ;;  %v641_v40 = vld [vmem:[%s1395_s17 + $0x3] sm:$0x1]  ;;  %v642_v41 = vld [vmem:[%s1395_s17 + $0x7] sm:$0x1] }
  0x75   : > { %v332_v54 = vsel %vm331_vm5, %v330_v39, %v329_v50  ;;  %v438_v57 = vunpack.c.l.b16 %v409_v47  ;;  %v439_v59 = vunpack.c.l.b16 %v410_v48  ;;  %v440_v60 = vunpack.c.l.b16 %v411_v49  ;;  %v643_v46 = vld [vmem:[%s1395_s17 + $0xb] sm:$0x1]  ;;  %v644_v47 = vld [vmem:[%s1395_s17 + $0xf] sm:$0x1]  ;;  %v645_v48 = vld [vmem:[%s1395_s17 + $0x13] sm:$0x1] }
  0x76   : > { %v335_v58 = vsel %vm334_vm6, %v333_v43, %v332_v54  ;;  %v441_v61 = vunpack.c.l.b16 %v412_v51  ;;  %v442_v2 = vunpack.c.l.b16 %v413_v52  ;;  %v443_v3 = vunpack.c.l.b16 %v414_v53  ;;  %v1031_v50 = vld [vmem:[#allocation8 + $0x30] sm:$0xff]   ;;  %s905_s27 = sld [smem:[#allocation3 + $0x3]]  ;;  %s761_s29 = sld [smem:[#allocation2]] }
  0x77   : > { %v338_v0 = vsel %vm337_vm7, %v336_v45, %v335_v58  ;;  %v444_v4 = vunpack.c.l.b16 %v415_v55  ;;  %v445_v9 = vunpack.c.l.b16 %v416_v56  ;;  %v446_v10 = vrot.slane %v439_v59, 7  ;;  %v646_v54 = vld [vmem:[%s1395_s17 + $0x17] sm:$0x1]  ;;  %v647_v59 = vld [vmem:[%s1395_s17 + $0x1b] sm:$0x1]  ;;  %s883_s10 = sshll.u32 %s1391_s0, 3 }
  0x78   : > { %v339_v8 = vpack.c.b16 %v338_v0, %v338_v0  ;;  %v448_v11 = vrot.slane %v440_v60, 6  ;;  %v450_v14 = vrot.slane %v441_v61, 5  ;;  %v452_v15 = vrot.slane %v442_v2, 4  ;;  %s907_s13 = sshll.u32 %s1245_s1, 7  ;;  %s272_s15 = scalar_lea.vmem [#allocation10], %s883_s10 }
  0x79   : > { %v454_v16 = vrot.slane %v443_v3, 3  ;;  %v447_v18 = vsel %vm319_vm1, %v446_v10, %v438_v57  ;;  %v456_v19 = vrot.slane %v444_v4, 2  ;;  %v529_v21 = vpack.c.bf16 %v521_v63, %v521_v63  ;;  %p1569_p1 = scmp.ne.s32.totalorder %s1558_s6, 0  ;;  %s1190_s1 = smov [#allocation10]  }
  0x7a   : > { %928 = vmatmul.mubr.msk.bf16.vlgmr.msra.gmra.mrb[0].mxu0 %vm352_vm8, %v339_v8  ;;  %v530_v22 = vpack.c.bf16 %v522_v5, %v522_v5  ;;  %v449_v23 = vsel %vm322_vm2, %v448_v11, %v447_v18  ;;  %v458_v24 = vrot.slane %v445_v9, 1  ;;  %v531_v26 = vpack.c.bf16 %v523_v6, %v523_v6  ;;  %v1033_v6 = vld [vmem:[#allocation8 + $0x38] sm:$0xff]   ;;  %s1111_s12 = sshll.u32 %s1190_s1, 4  ;;  %s1112_s12 = int_to_ptr.vmem [resolvable:$false] %s1111_s12 }
  0x7b   : > { %940 = vmatpush3.bf16.msra.mxu0 %v1030_v62  ;;  %943 = vmatprep.mubr.msk.bf16.mxu0 %vm1189_vm0, %v1188_v1  ;;  %v532_v27 = vpack.c.bf16 %v524_v7, %v524_v7  ;;  %v451_v28 = vsel %vm325_vm3, %v450_v14, %v449_v23  ;;  %v533_v29 = vpack.c.bf16 %v525_v12, %v525_v12  ;;  %v558_v34 = vunpack.c.l.b16 %v529_v21  ;;  %v648_v62 = vld [vmem:[%s1395_s17 + $0x1f] sm:$0x1]  ;;  %s779_s17 = sshll.u32 %s272_s15, 4  ;;  %s1504_s17 = int_to_ptr.vmem [resolvable:$true] %s779_s17 }
  0x7c   : > { %941 = vmatprep.subr.bf16.mxu0 %v1188_v1  ;;  %v534_v30 = vpack.c.bf16 %v526_v13, %v526_v13  ;;  %v535_v31 = vpack.c.bf16 %v527_v17, %v527_v17  ;;  %v453_v32 = vsel %vm328_vm4, %v452_v15, %v451_v28  ;;  %v536_v33 = vpack.c.bf16 %v528_v20, %v528_v20  ;;  %s1107_s9 = scalar_lea.vmem %s1504_s17, 128  ;;  %p1114_p6 = scmp.lt.s32.totalorder %s1504_s17, %s1112_s12 }
  0x7d   : > { %v559_v35 = vunpack.c.l.b16 %v530_v22  ;;  %v455_v36 = vsel %vm331_vm5, %v454_v16, %v453_v32  ;;  %v560_v37 = vunpack.c.l.b16 %v531_v26  ;;  %v561_v38 = vunpack.c.l.b16 %v532_v27  ;;  %p1108_p10 = scmp.ne.s32.totalorder %s1504_s17, %s1107_s9 }
  0x7e   : > { %v562_v39 = vunpack.c.l.b16 %v533_v29  ;;  %v457_v42 = vsel %vm334_vm6, %v456_v19, %v455_v36  ;;  %v563_v43 = vunpack.c.l.b16 %v534_v30  ;;  %v564_v44 = vunpack.c.l.b16 %v535_v31 }
  0x7f   : > { %942 = vmatpush3.bf16.msra.mxu0 %v1032_v25  ;;  %v565_v45 = vunpack.c.l.b16 %v536_v33  ;;  %v459_v49 = vsel %vm337_vm7, %v458_v24, %v457_v42  ;;  %v566_v51 = vrot.slane %v559_v35, 7  ;;  %v568_v52 = vrot.slane %v560_v37, 6  ;;  %p1109_p5 = pnand %p1108_p10, %p1569_p1 }
  0x80   : > { %v570_v53 = vrot.slane %v561_v38, 5  ;;  %v460_v55 = vpack.c.b16 %v459_v49, %v459_v49  ;;  %v572_v56 = vrot.slane %v562_v39, 4  ;;  %v574_v57 = vrot.slane %v563_v43, 3  ;;  %v884_v39 = vld [vmem:[%s1550_s4] ss:$0 sm:$0xff] }
  0x81   : > { %v576_v58 = vrot.slane %v564_v44, 2  ;;  %v567_v60 = vsel %vm319_vm1, %v566_v51, %v558_v34  ;;  %v578_v61 = vrot.slane %v565_v45, 1  ;;  %v649_v63 = vpack.c.bf16 %v641_v40, %v641_v40  ;;  %v889_v44 = vld [vmem:[%s1550_s4 + $0x1] ss:$0 sm:$0xff]  ;;  %p1110_p4 = pneg %p1109_p5 }
  0x82   : > { %v650_v0 = vpack.c.bf16 %v642_v41, %v642_v41  ;;  %936 = vmatmul.mubr.msk.bf16.vlgmr.msra.gmra.mrb[0].mxu1 %vm352_vm8, %v460_v55  ;;  %v569_v2 = vsel %vm322_vm2, %v568_v52, %v567_v60  ;;  %v651_v3 = vpack.c.bf16 %v643_v46, %v643_v46  ;;  %v652_v4 = vpack.c.bf16 %v644_v47, %v644_v47 }
  0x83   : > { %v653_v5 = vpack.c.bf16 %v645_v48, %v645_v48  ;;  %948 = vmatpush3.bf16.msra.mxu1 %v1031_v50  ;;  %951 = vmatprep.mubr.msk.bf16.mxu1 %vm1189_vm0, %v1188_v1  ;;  %v571_v7 = vsel %vm325_vm3, %v570_v53, %v569_v2  ;;  %v654_v8 = vpack.c.bf16 %v646_v54, %v646_v54  ;;  %v678_v10 = vunpack.c.l.b16 %v649_v63 }
  0x84   : > { %v655_v9 = vpack.c.bf16 %v647_v59, %v647_v59  ;;  %949 = vmatprep.subr.bf16.mxu1 %v1188_v1  ;;  %v573_v11 = vsel %vm328_vm4, %v572_v56, %v571_v7  ;;  %v656_v12 = vpack.c.bf16 %v648_v62, %v648_v62  ;;  %v679_v13 = vunpack.c.l.b16 %v650_v0  ;;  %v895_v56 = vld [vmem:[%s1550_s4 + $0x2] ss:$0 sm:$0xff] }
  0x85   : > { %v680_v14 = vunpack.c.l.b16 %v651_v3  ;;  %v575_v15 = vsel %vm331_vm5, %v574_v57, %v573_v11  ;;  %v681_v16 = vunpack.c.l.b16 %v652_v4  ;;  %v682_v17 = vunpack.c.l.b16 %v653_v5  ;;  %v901_v3 = vld [vmem:[%s1550_s4 + $0x3] ss:$0 sm:$0xff] }
  0x86   : > { %v683_v18 = vunpack.c.l.b16 %v654_v8  ;;  %v577_v19 = vsel %vm334_vm6, %v576_v58, %v575_v15  ;;  %v684_v20 = vunpack.c.l.b16 %v655_v9  ;;  %v685_v21 = vunpack.c.l.b16 %v656_v12 }
  0x87   : > { %v686_v22 = vrot.slane %v679_v13, 7  ;;  %950 = vmatpush3.bf16.msra.mxu1 %v1033_v6  ;;  %v579_v23 = vsel %vm337_vm7, %v578_v61, %v577_v19  ;;  %v688_v24 = vrot.slane %v680_v14, 6  ;;  %v690_v1 = vrot.slane %v681_v16, 5 }
  0x88   : > { %v692_v25 = vrot.slane %v682_v17, 4  ;;  %v580_v26 = vpack.c.b16 %v579_v23, %v579_v23  ;;  %v694_v28 = vrot.slane %v683_v18, 3  ;;  %v696_v30 = vrot.slane %v684_v20, 2 }
  0x89   : > { %v687_v27 = vsel %vm319_vm1, %v686_v22, %v678_v10  ;;  %v698_v32 = vrot.slane %v685_v21, 1  ;;  %v398_v46 = vstv %s397_s14  ;;  %v518_v50 = vstv %s893_s16  ;;  %s1502_s14 = scalar_lea.hbm %s1551_s5, %s907_s13  ;;  %s766_s16 = scalar_lea.sflag [#allocation5], %s1391_s0 }
  0x8a   : > { %v689_v29 = vsel %vm322_vm2, %v688_v24, %v687_v27  ;;  %944 = vmatmul.mubr.msk.bf16.vlgmr.msra.gmra.mrb[4].mxu0 %vm352_vm8, %v580_v26  ;;  %v638_v61 = vstv %s899_s11  ;;  %v758_v8 = vstv %s905_s27  ;;  %v762_v13 = vstv %s761_s29  ;;  %s1113_s11 = scalar_lea.vmem %s1112_s12, 256 }
  0x8b   : > { %v691_v31 = vsel %vm325_vm3, %v690_v1, %v689_v29  ;;  %p1115_p9 = scmp.lt.s32.totalorder %s1113_s11, %s1107_s9 }
  0x8c   : > { %v693_v33 = vsel %vm328_vm4, %v692_v25, %v691_v31 }
  0x8d   : > { %v695_v34 = vsel %vm331_vm5, %v694_v28, %v693_v33  ;;  %p1116_p11 = por %p1115_p9, %p1114_p6 }
  0x8e   : > { %v697_v35 = vsel %vm334_vm6, %v696_v30, %v695_v34 }
  0x8f   : > { %v699_v36 = vsel %vm337_vm7, %v698_v32, %v697_v35  ;;  %p1117_p0 = pnand %p1116_p11, %p1110_p4 }
  0x90   : > { %v700_v37 = vpack.c.b16 %v699_v36, %v699_v36 }
  0x92   : > { %952 = vmatmul.mubr.msk.bf16.vlgmr.msra.gmra.mrb[4].mxu1 %vm352_vm8, %v700_v37 }
 0x14d   : > { %v390_v38 = vpop.f32.mrb[0].mxu0 }
 0x14e   : > { %v929_v40 = vpop.f32.mrb[1].mxu0  ;;  %v391_v43 = vadd.f32 %v884_v39, %v390_v38 }
 0x14f   : > { %v393_v41 = vpop.f32.mrb[2].mxu0 }
 0x150   : > { %v930_v42 = vpop.f32.mrb[3].mxu0  ;;  %v396_v45 = vmax.f32 %v391_v43, 0.0 }
 0x152   : > { %v399_v52 = vmul.f32 %v398_v46, %v396_v45 }
 0x155   : > { %v510_v47 = vpop.f32.mrb[0].mxu1 }
 0x156   : > { %v511_v48 = vadd.f32 %v889_v44, %v510_v47  ;;  %v937_v49 = vpop.f32.mrb[1].mxu1 }
 0x157   : > { %v513_v51 = vpop.f32.mrb[2].mxu1 }
 0x158   : > { %v516_v53 = vmax.f32 %v511_v48, 0.0  ;;  %v938_v54 = vpop.f32.mrb[3].mxu1 }
 0x15a   : > { %v519_v55 = vmul.f32 %v518_v50, %v516_v53 }
 0x15c   : > { %v520_v57 = vadd.f32 %v519_v55, %v399_v52 }
 0x15d   : > { %v630_v58 = vpop.f32.mrb[4].mxu0 }
 0x15e   : > { %v631_v59 = vadd.f32 %v895_v56, %v630_v58  ;;  %v945_v60 = vpop.f32.mrb[5].mxu0 }
 0x15f   : > { %v633_v62 = vpop.f32.mrb[6].mxu0 }
 0x160   : > { %v636_v63 = vmax.f32 %v631_v59, 0.0  ;;  %v946_v0 = vpop.f32.mrb[7].mxu0 }
 0x162   : > { %v639_v2 = vmul.f32 %v638_v61, %v636_v63 }
 0x164   : > { %v640_v4 = vadd.f32 %v639_v2, %v520_v57 }
 0x165   : > { %v750_v5 = vpop.f32.mrb[4].mxu1 }
 0x166   : > { %v751_v6 = vadd.f32 %v901_v3, %v750_v5  ;;  %v953_v7 = vpop.f32.mrb[5].mxu1 }
 0x167   : > { %v753_v9 = vpop.f32.mrb[6].mxu1 }
 0x168   : > { %v756_v10 = vmax.f32 %v751_v6, 0.0  ;;  %v954_v11 = vpop.f32.mrb[7].mxu1 }
 0x16a   : > { %v759_v12 = vmul.f32 %v758_v8, %v756_v10 }
 0x16c   : > { %v760_v14 = vadd.f32 %v759_v12, %v640_v4 }
 0x16e   : > { %v763_v15 = vadd.f32 %v762_v13, %v760_v14 }
 0x170   : > { %764 = vst [vmem:[%s272_s15] sm:$0xff] %v763_v15 }
 0x171   : > { %1120 = shalt.err (!%p1117_p0)
}
 0x172   : > { %s1121_s0 = scalar_lea.hbm %s1502_s14, 128  ;;  %s1125_s27 = scalar_lea.hbm %s1551_s5, 256 }
 0x173   : > { %p1122_p2 = scmp.ne.s32.totalorder %s1502_s14, %s1121_s0  ;;  %p1126_p3 = scmp.lt.u32.totalorder %s1502_s14, %s1551_s5 }
 0x174   : > { %p1127_p13 = scmp.lt.u32.totalorder %s1125_s27, %s1121_s0  ;;  %p1129_p10 = scmp.lt.u32.totalorder %s1121_s0, %s1502_s14 }
 0x175   : > { %p1123_p7 = pnand %p1122_p2, %p1569_p1 }
 0x176   : > { %p1128_p8 = por %p1127_p13, %p1126_p3 }
 0x177   : > { %p1124_p12 = pneg %p1123_p7 }
 0x178   : > { %p1130_p5 = por %p1129_p10, %p1128_p8 }
 0x17a   : > { %p1131_p4 = pnand %p1130_p5, %p1124_p12 }
 0x17c   : > { %1134 = shalt.err (!%p1131_p4)
}
 0x17d   : > { %965 = dma.vmem_to_hbm [thread:$0]  (%p1569_p1), %s1504_s17, 128, %s1502_s14, %s766_s16  }
 0x17e PF: > { %s791_s29 = sand.u32 1, %s1169_s20   ;;  %p1570_p6 = scmp.ne.s32.totalorder %s1559_s7, 0 }
 0x17f   : > { %p1571_p9 = scmp.ge.s32.totalorder %s1181_s23, 2  ;;  %s792_s10 = scalar_lea.sflag [#allocation5], %s791_s29 }
 0x181   : > { %p979_p11 = pnand %p1571_p9, %p1570_p6 }
 0x183   : > { %1164 = dma.done.wait (!%p979_p11), %s792_s10, 128  }
 0x184   : > { %1166 = vsyncadd (!%p979_p11), %s792_s10, 4294967168  ;;  %p21_p0 = scmp.ge.s32.totalorder %s1249_s25, 4   ;;  %s1572_s20 = smov %s1173_s21 }
 0x185   : > { %s1573_s21 = smov %s1177_s22  ;;  %s1574_s22 = smov %s1261_s28 }
 0x186   : > { %s1575_s23 = smov %s1249_s25  ;;  %23 = sbr.rel (!%p21_p0) target bundleno = 10 (0xa), region = 100 }
 0x18d   :  { %797 = vsyncpa [#allocation4], 1 }
 0x18e   :  { %799 = vsyncpa [#allocation4 + $0x1], 1 }
 0x18f   :  { %800 = vsyncpa [#allocation9], 1 }
 0x190   :  { %801 = vsyncpa [#allocation5], 1 }
 0x191   :  { %803 = vsyncpa [#allocation5 + $0x1], 1 }
 0x192   :  { %804 = vsyncpa [#allocation6], 1 }
 0x193   :  { %806 = vsyncpa [#allocation6 + $0x1], 1 }

</bundles_post_ra>
